<compile_context>
chip_gen: v6e
topology: v6e:2x2x1
jax: 0.10.0
libtpu: 0.0.40
codegen_flags: <defaults>
</compile_context>

<pallas_src>
import functools

import jax
import jax.numpy as jnp
from jax.experimental import pallas as pl
from jax.experimental.pallas import tpu as pltpu


def _round_up(x, m):
    return (x + m - 1) // m * m


def fused_gcn_kernel(adj_ref, x_ref, w_ref, b_ref, o_ref, *, n_layers):
    """All GCN layers chained through VMEM-resident values; one HBM write.

    adj_ref: (N_pad, N_pad) bf16 normalized adjacency (zero-padded).
    x_ref:   (N_pad, F_pad) bf16 node features (zero-padded).
    w_ref:   (L, F_pad, F_pad) bf16 stacked layer weights (zero-padded).
    b_ref:   (L, 1, F_pad) f32 stacked biases (zero-padded).
    o_ref:   (N_pad, F_pad) f32 final node embeddings.
    """
    adj = adj_ref[...]                 # bf16 adjacency, VMEM-resident
    h = x_ref[...]                     # bf16 features
    hf = None
    for l in range(n_layers):          # static unroll; n_layers known at trace time
        # Feature transform on the MXU: bf16 operands, f32 accumulation.
        # Computed exactly once per layer.
        xw = jnp.dot(h, w_ref[l], preferred_element_type=jnp.float32)
        # Neighborhood aggregation A_hat @ (H W): bf16 operands, f32 acc.
        hf = jnp.dot(adj, xw.astype(jnp.bfloat16),
                     preferred_element_type=jnp.float32)
        # Bias-add / ReLU stay in f32 on the VPU.
        hf = hf + b_ref[l]             # (1, F_pad) broadcast over rows
        if l < n_layers - 1:
            hf = jnp.maximum(hf, 0.0)  # ReLU on all but the last layer
        h = hf.astype(jnp.bfloat16)    # next layer's matmul input in bf16
        # TODO(synk): nn.Dropout(0.5) is identity in eval mode; training-mode
        # stochastic dropout is omitted here.
    o_ref[...] = hf.astype(o_ref.dtype)


def gnn_forward(adj_hat, features, params, *, f_pad=128):
    """Equivalent of GNNModel.forward for the 'gcn' layer type (eval mode)."""
    n_layers = len(params)
    n = adj_hat.shape[0]
    # Lane dim must be 128-dense: round node count up to 128 so adjacency
    # loads and the adj @ xw contraction are unmasked / lane-dense.
    n_pad = _round_up(n, 128)
    f_in = features.shape[1]
    n_classes = params[-1][0].shape[1]
    max_dim = max([f_in] + [w.shape[1] for (w, _) in params])
    assert max_dim <= f_pad, "feature dims must fit the padded lane width"

    # Zero-padded, lane-dense operands.  Matmul operands are bf16; biases stay
    # f32 for the f32 VPU chain.  Padding is exact: padded feature columns of
    # X are zero and padded rows/cols of W / padded bias lanes are zero, so
    # real outputs are untouched and padded lanes stay zero through
    # bias/ReLU.  Padded node rows (n..n_pad-1) do pick up the bias each
    # layer, but their adjacency columns are zero so they never contaminate
    # real rows and they are sliced off at the end -- keep this invariant if
    # editing (e.g. don't add row-normalization over padded rows).
    adj_p = (jnp.zeros((n_pad, n_pad), jnp.bfloat16)
             .at[:n, :n].set(adj_hat.astype(jnp.bfloat16)))
    x_p = (jnp.zeros((n_pad, f_pad), jnp.bfloat16)
           .at[:n, :f_in].set(features.astype(jnp.bfloat16)))
    w_stack = jnp.zeros((n_layers, f_pad, f_pad), jnp.bfloat16)
    b_stack = jnp.zeros((n_layers, 1, f_pad), jnp.float32)
    for l, (w, b) in enumerate(params):
        fi, fo = w.shape
        w_stack = w_stack.at[l, :fi, :fo].set(w.astype(jnp.bfloat16))
        b_stack = b_stack.at[l, :, :fo].set(b)

    kernel = functools.partial(fused_gcn_kernel, n_layers=n_layers)
    # TODO(synk): large-graph path -- keep A_hat in HBM
    # (BlockSpec(memory_space=pl.ANY)) and stream (TM, n_pad) row tiles per
    # layer over a "parallel" row-tile grid axis (v7x: 2 TensorCores) so VMEM
    # never holds the full O(N^2) adjacency.
    out_p = pl.pallas_call(
        kernel,
        out_shape=jax.ShapeDtypeStruct((n_pad, f_pad), jnp.float32),
        grid_spec=pltpu.PrefetchScalarGridSpec(
            num_scalar_prefetch=0,
            grid=(1,),
            in_specs=[
                pl.BlockSpec((n_pad, n_pad), lambda i: (0, 0)),               # A_hat (bf16)
                pl.BlockSpec((n_pad, f_pad), lambda i: (0, 0)),               # X (bf16)
                pl.BlockSpec((n_layers, f_pad, f_pad), lambda i: (0, 0, 0)),  # W stack (bf16)
                pl.BlockSpec((n_layers, 1, f_pad), lambda i: (0, 0, 0)),      # b stack (f32)
            ],
            out_specs=pl.BlockSpec((n_pad, f_pad), lambda i: (0, 0)),
        ),
        # Footprint is well under 1 MiB at demo size; leave the default
        # scoped-VMEM limit instead of reserving 64 MiB (v7x headroom).
        compiler_params=pltpu.CompilerParams(
            dimension_semantics=("arbitrary",),
        ),
    )(adj_p, x_p, w_stack, b_stack)
    # Slice the real nodes / real classes back out (cheap XLA slice).
    return out_p[:n, :n_classes]


def gnn_forward_reference(adj_hat, features, params):
    """Pure-JAX full-precision f32 reference (same math)."""
    h = features
    hp = jax.lax.Precision.HIGHEST
    for idx, (w, b) in enumerate(params):
        h = jnp.dot(adj_hat, jnp.dot(h, w, precision=hp), precision=hp) + b
        if idx < len(params) - 1:
            h = jnp.maximum(h, 0.0)
    return h


def gnn_forward_reference_bf16(adj_hat, features, params):
    """Pure-JAX reference matching the kernel's numerics exactly:
    bf16 matmul operands, f32 accumulation, f32 bias/ReLU."""
    adj = adj_hat.astype(jnp.bfloat16)
    h = features.astype(jnp.bfloat16)
    hf = None
    for idx, (w, b) in enumerate(params):
        xw = jnp.dot(h, w.astype(jnp.bfloat16),
                     preferred_element_type=jnp.float32)
        hf = jnp.dot(adj, xw.astype(jnp.bfloat16),
                     preferred_element_type=jnp.float32) + b
        if idx < len(params) - 1:
            hf = jnp.maximum(hf, 0.0)
        h = hf.astype(jnp.bfloat16)
    return hf


def init_gnn_params(key, gnn_layer, n_layers, layer_dim, input_feature_dim,
                    n_classes):
    """Deterministic parameter init matching GNNModel.__init__ shapes."""
    assert gnn_layer == "gcn"
    assert n_layers >= 1
    dims = [input_feature_dim] + [layer_dim] * (n_layers - 1) + [n_classes]
    params = []
    for idx in range(len(dims) - 1):
        key, wk = jax.random.split(key)
        fan_in, fan_out = dims[idx], dims[idx + 1]
        # dgl GraphConv: xavier-uniform weight, zero bias.
        limit = (6.0 / (fan_in + fan_out)) ** 0.5
        w = jax.random.uniform(wk, (fan_in, fan_out), jnp.float32,
                               minval=-limit, maxval=limit)
        b = jnp.zeros((1, fan_out), jnp.float32)
        params.append((w, b))
    return params


def build_normalized_adjacency(key, n_nodes, edge_prob=0.05):
    """Dense A_hat = D_in^{-1/2} A D_out^{-1/2} (dgl GraphConv norm='both')."""
    a = jax.random.bernoulli(key, edge_prob, (n_nodes, n_nodes)).astype(
        jnp.float32)
    # self-loops so every node has nonzero in/out degree (synthetic graph)
    a = jnp.maximum(a, jnp.eye(n_nodes, dtype=jnp.float32))
    deg_in = a.sum(axis=1)    # row sums  (destination degree)
    deg_out = a.sum(axis=0)   # col sums  (source degree)
    d_in_inv_sqrt = 1.0 / jnp.sqrt(deg_in)
    d_out_inv_sqrt = 1.0 / jnp.sqrt(deg_out)
    return a * d_in_inv_sqrt[:, None] * d_out_inv_sqrt[None, :]


if __name__ == "__main__":
    key = jax.random.PRNGKey(0)
    k_graph, k_feat, k_param = jax.random.split(key, 3)

    # Small, kernel-friendly shapes.
    n_nodes = 128
    input_feature_dim = 16
    layer_dim = 32
    n_classes = 8
    n_layers = 3  # dims = [16, 32, 32, 8]

    adj_hat = build_normalized_adjacency(k_graph, n_nodes)
    features = jax.random.normal(k_feat, (n_nodes, input_feature_dim),
                                 jnp.float32)
    params = init_gnn_params(k_param, "gcn", n_layers, layer_dim,
                             input_feature_dim, n_classes)

    fwd = jax.jit(gnn_forward)
    out = jax.block_until_ready(fwd(adj_hat, features, params))
    assert out.shape == (n_nodes, n_classes)

    # Check against a reference with the kernel's exact numerics
    # (bf16 operands, f32 accumulation): should be near-identical.
    ref_bf16 = jax.block_until_ready(
        gnn_forward_reference_bf16(adj_hat, features, params))
    assert jnp.allclose(out, ref_bf16, rtol=1e-3, atol=1e-3), (
        float(jnp.max(jnp.abs(out - ref_bf16))))

    # Sanity check against the full-precision f32 reference (tolerance covers
    # the bf16-operand error budget over 3 layers).
    ref_f32 = jax.block_until_ready(
        gnn_forward_reference(adj_hat, features, params))
    assert jnp.allclose(out, ref_f32, rtol=3e-2, atol=3e-2), (
        float(jnp.max(jnp.abs(out - ref_f32))))

    print("KERNEL_OK")
</pallas_src>

<mosaic_0001>
module attributes {stable_mosaic.version = 11 : i64} {
  func.func @fused_gcn_kernel(%arg0: i32, %arg1: memref<128x128xbf16, #tpu.memory_space<vmem>>, %arg2: memref<128x128xbf16, #tpu.memory_space<vmem>>, %arg3: memref<3x128x128xbf16, #tpu.memory_space<vmem>>, %arg4: memref<3x1x128xf32, #tpu.memory_space<vmem>>, %arg5: memref<128x128xf32, #tpu.memory_space<vmem>>) attributes {dimension_semantics = [#tpu.dimension_semantics<arbitrary>], iteration_bounds = array<i64: 1>, scalar_prefetch = 0 : i64, scratch_operands = 0 : i64, tpu.core_type = #tpu.core_type<tc>, window_params = [{pipeline_mode = #tpu.pipeline_mode<synchronous>, transform_indices = @transform_0, window_bounds = array<i64: 128, 128>}, {pipeline_mode = #tpu.pipeline_mode<synchronous>, transform_indices = @transform_1, window_bounds = array<i64: 128, 128>}, {pipeline_mode = #tpu.pipeline_mode<synchronous>, transform_indices = @transform_2, window_bounds = array<i64: 3, 128, 128>}, {pipeline_mode = #tpu.pipeline_mode<synchronous>, transform_indices = @transform_3, window_bounds = array<i64: 3, 1, 128>}, {pipeline_mode = #tpu.pipeline_mode<synchronous>, transform_indices = @transform_4, window_bounds = array<i64: 128, 128>}]} {
    %c0 = arith.constant 0 : index
    %c0_0 = arith.constant 0 : index
    %0 = vector.load %arg1[%c0, %c0_0] : memref<128x128xbf16, #tpu.memory_space<vmem>>, vector<128x128xbf16>
    %c0_1 = arith.constant 0 : index
    %c0_2 = arith.constant 0 : index
    %1 = vector.load %arg2[%c0_1, %c0_2] : memref<128x128xbf16, #tpu.memory_space<vmem>>, vector<128x128xbf16>
    %c0_3 = arith.constant 0 : index
    %c0_4 = arith.constant 0 : index
    %c0_5 = arith.constant 0 : index
    %2 = vector.load %arg3[%c0_3, %c0_4, %c0_5] : memref<3x128x128xbf16, #tpu.memory_space<vmem>>, vector<1x128x128xbf16>
    %3 = vector.shape_cast %2 : vector<1x128x128xbf16> to vector<128x128xbf16>
    %cst = arith.constant dense<0.000000e+00> : vector<128x128xf32>
    %4 = tpu.matmul %1, %3, %cst {dimension_numbers = #tpu.dot_dimension_numbers<[1], [0], [0], [1], [0, 0, 1, 1], [], []>} : vector<128x128xbf16>, vector<128x128xbf16>, vector<128x128xf32> -> vector<128x128xf32>
    %5 = arith.truncf %4 : vector<128x128xf32> to vector<128x128xbf16>
    %cst_6 = arith.constant dense<0.000000e+00> : vector<128x128xf32>
    %6 = tpu.matmul %0, %5, %cst_6 {dimension_numbers = #tpu.dot_dimension_numbers<[1], [0], [0], [1], [0, 0, 1, 1], [], []>} : vector<128x128xbf16>, vector<128x128xbf16>, vector<128x128xf32> -> vector<128x128xf32>
    %c0_7 = arith.constant 0 : index
    %c0_8 = arith.constant 0 : index
    %c0_9 = arith.constant 0 : index
    %7 = vector.load %arg4[%c0_7, %c0_8, %c0_9] : memref<3x1x128xf32, #tpu.memory_space<vmem>>, vector<1x1x128xf32>
    %8 = vector.shape_cast %7 : vector<1x1x128xf32> to vector<1x128xf32>
    %9 = vector.broadcast %8 : vector<1x128xf32> to vector<128x128xf32>
    %10 = arith.addf %6, %9 : vector<128x128xf32>
    %cst_10 = arith.constant 0.000000e+00 : f32
    %11 = vector.broadcast %cst_10 : f32 to vector<128x128xf32>
    %12 = arith.maximumf %10, %11 : vector<128x128xf32>
    %13 = arith.truncf %12 : vector<128x128xf32> to vector<128x128xbf16>
    %c1 = arith.constant 1 : index
    %c0_11 = arith.constant 0 : index
    %c0_12 = arith.constant 0 : index
    %14 = vector.load %arg3[%c1, %c0_11, %c0_12] : memref<3x128x128xbf16, #tpu.memory_space<vmem>>, vector<1x128x128xbf16>
    %15 = vector.shape_cast %14 : vector<1x128x128xbf16> to vector<128x128xbf16>
    %cst_13 = arith.constant dense<0.000000e+00> : vector<128x128xf32>
    %16 = tpu.matmul %13, %15, %cst_13 {dimension_numbers = #tpu.dot_dimension_numbers<[1], [0], [0], [1], [0, 0, 1, 1], [], []>} : vector<128x128xbf16>, vector<128x128xbf16>, vector<128x128xf32> -> vector<128x128xf32>
    %17 = arith.truncf %16 : vector<128x128xf32> to vector<128x128xbf16>
    %cst_14 = arith.constant dense<0.000000e+00> : vector<128x128xf32>
    %18 = tpu.matmul %0, %17, %cst_14 {dimension_numbers = #tpu.dot_dimension_numbers<[1], [0], [0], [1], [0, 0, 1, 1], [], []>} : vector<128x128xbf16>, vector<128x128xbf16>, vector<128x128xf32> -> vector<128x128xf32>
    %c1_15 = arith.constant 1 : index
    %c0_16 = arith.constant 0 : index
    %c0_17 = arith.constant 0 : index
    %19 = vector.load %arg4[%c1_15, %c0_16, %c0_17] : memref<3x1x128xf32, #tpu.memory_space<vmem>>, vector<1x1x128xf32>
    %20 = vector.shape_cast %19 : vector<1x1x128xf32> to vector<1x128xf32>
    %21 = vector.broadcast %20 : vector<1x128xf32> to vector<128x128xf32>
    %22 = arith.addf %18, %21 : vector<128x128xf32>
    %cst_18 = arith.constant 0.000000e+00 : f32
    %23 = vector.broadcast %cst_18 : f32 to vector<128x128xf32>
    %24 = arith.maximumf %22, %23 : vector<128x128xf32>
    %25 = arith.truncf %24 : vector<128x128xf32> to vector<128x128xbf16>
    %c2 = arith.constant 2 : index
    %c0_19 = arith.constant 0 : index
    %c0_20 = arith.constant 0 : index
    %26 = vector.load %arg3[%c2, %c0_19, %c0_20] : memref<3x128x128xbf16, #tpu.memory_space<vmem>>, vector<1x128x128xbf16>
    %27 = vector.shape_cast %26 : vector<1x128x128xbf16> to vector<128x128xbf16>
    %cst_21 = arith.constant dense<0.000000e+00> : vector<128x128xf32>
    %28 = tpu.matmul %25, %27, %cst_21 {dimension_numbers = #tpu.dot_dimension_numbers<[1], [0], [0], [1], [0, 0, 1, 1], [], []>} : vector<128x128xbf16>, vector<128x128xbf16>, vector<128x128xf32> -> vector<128x128xf32>
    %29 = arith.truncf %28 : vector<128x128xf32> to vector<128x128xbf16>
    %cst_22 = arith.constant dense<0.000000e+00> : vector<128x128xf32>
    %30 = tpu.matmul %0, %29, %cst_22 {dimension_numbers = #tpu.dot_dimension_numbers<[1], [0], [0], [1], [0, 0, 1, 1], [], []>} : vector<128x128xbf16>, vector<128x128xbf16>, vector<128x128xf32> -> vector<128x128xf32>
    %c2_23 = arith.constant 2 : index
    %c0_24 = arith.constant 0 : index
    %c0_25 = arith.constant 0 : index
    %31 = vector.load %arg4[%c2_23, %c0_24, %c0_25] : memref<3x1x128xf32, #tpu.memory_space<vmem>>, vector<1x1x128xf32>
    %32 = vector.shape_cast %31 : vector<1x1x128xf32> to vector<1x128xf32>
    %33 = vector.broadcast %32 : vector<1x128xf32> to vector<128x128xf32>
    %34 = arith.addf %30, %33 : vector<128x128xf32>
    %c0_26 = arith.constant 0 : index
    %c0_27 = arith.constant 0 : index
    %35 = vector.load %arg5[%c0_26, %c0_27] : memref<128x128xf32, #tpu.memory_space<vmem>>, vector<128x128xf32>
    tpu.vector_store %arg5[%c0_26, %c0_27], %34 {strides = array<i32>} : memref<128x128xf32, #tpu.memory_space<vmem>>, vector<128x128xf32>,
    return
  }
  func.func @transform_0(%arg0: i32) -> (i32, i32) {
    %c0_i32 = arith.constant 0 : i32
    %c0_i32_0 = arith.constant 0 : i32
    %c0_i32_1 = arith.constant 0 : i32
    return %c0_i32, %c0_i32_0 : i32, i32
  }
  func.func @transform_1(%arg0: i32) -> (i32, i32) {
    %c0_i32 = arith.constant 0 : i32
    %c0_i32_0 = arith.constant 0 : i32
    %c0_i32_1 = arith.constant 0 : i32
    return %c0_i32, %c0_i32_0 : i32, i32
  }
  func.func @transform_2(%arg0: i32) -> (i32, i32, i32) {
    %c0_i32 = arith.constant 0 : i32
    %c0_i32_0 = arith.constant 0 : i32
    %c0_i32_1 = arith.constant 0 : i32
    %c0_i32_2 = arith.constant 0 : i32
    return %c0_i32, %c0_i32_0, %c0_i32_1 : i32, i32, i32
  }
  func.func @transform_3(%arg0: i32) -> (i32, i32, i32) {
    %c0_i32 = arith.constant 0 : i32
    %c0_i32_0 = arith.constant 0 : i32
    %c0_i32_1 = arith.constant 0 : i32
    %c0_i32_2 = arith.constant 0 : i32
    return %c0_i32, %c0_i32_0, %c0_i32_1 : i32, i32, i32
  }
  func.func @transform_4(%arg0: i32) -> (i32, i32) {
    %c0_i32 = arith.constant 0 : i32
    %c0_i32_0 = arith.constant 0 : i32
    %c0_i32_1 = arith.constant 0 : i32
    return %c0_i32, %c0_i32_0 : i32, i32
  }
}

</mosaic_0001>

<bundles_post_ra>
// kernel: gnn_forward.1
= control target key start
LH: loop header
LB: loop body
LE: loop exit
PB: predicated region body
PF: predicated region fallthrough
CT: control target
= control target key end

     0   :  { %s1684_s2 = inlined_call_operand.vmem [shape: bf16[3,128,128], index: 2, kind: input, shape index: {}]   ;;  %s1685_s1 = inlined_call_operand.vmem [shape: bf16[128,128], index: 1, kind: input, shape index: {}]   ;;  %s1686_s0 = inlined_call_operand.vmem [shape: bf16[128,128], index: 0, kind: input, shape index: {}]   ;;  %s1687_s3 = inlined_call_operand.vmem [shape: f32[3,1,128], index: 3, kind: input, shape index: {}]   ;;  %s1688_s4 = inlined_call_operand.vmem [shape: f32[128,128], index: 4, kind: output, shape index: {}]  }
   0x1   :  { %v1402_v0 = vld [vmem:[%s1684_s2 + $0x38] sm:$0xff]   ;;  %v1403_v1 = vld [vmem:[%s1684_s2 + $0x30] sm:$0xff]   ;;  %v1404_v2 = vld [vmem:[%s1684_s2 + $0x28] sm:$0xff]  }
   0x2   :  { %1210 = vmatprep.subr.bf16.mxu0 %v1402_v0  ;;  %v1405_v3 = vld [vmem:[%s1684_s2 + $0x20] sm:$0xff]   ;;  %v1406_v5 = vld [vmem:[%s1684_s2 + $0x18] sm:$0xff]   ;;  %v1407_v6 = vld [vmem:[%s1684_s2 + $0x10] sm:$0xff]  }
   0x3   :  { %1211 = vmatpush3.bf16.msra.mxu0 %v1402_v0  ;;  %v1410_v4 = vld [vmem:[%s1685_s1] sm:$0xff]   ;;  %v1408_v7 = vld [vmem:[%s1684_s2 + $0x8] sm:$0xff]   ;;  %v1412_v10 = vld [vmem:[%s1685_s1 + $0x10] sm:$0xff]  }
   0x4   :  { %1212 = vmatprep.subr.bf16.mxu0 %v1403_v1  ;;  %1226 = vmatprep.mubr.bf16.mxu0 %v1410_v4  ;;  %v1409_v8 = vld [vmem:[%s1684_s2] sm:$0xff]   ;;  %v1411_v9 = vld [vmem:[%s1685_s1 + $0x8] sm:$0xff]   ;;  %v1413_v11 = vld [vmem:[%s1685_s1 + $0x18] sm:$0xff]  }
   0x5   :  { %v1414_v12 = vld [vmem:[%s1685_s1 + $0x20] sm:$0xff]   ;;  %v1415_v13 = vld [vmem:[%s1685_s1 + $0x28] sm:$0xff]   ;;  %v1416_v14 = vld [vmem:[%s1685_s1 + $0x30] sm:$0xff]  }
   0x6   :  { %v1417_v15 = vld [vmem:[%s1685_s1 + $0x38] sm:$0xff]   ;;  %v1518_v16 = vld [vmem:[%s1686_s0] sm:$0xff]   ;;  %v1427_v18 = vld [vmem:[%s1684_s2 + $0x70] sm:$0xff]  }
   0x7   :  { %1213 = vmatpush3.bf16.msra.mxu0 %v1403_v1  ;;  %1258 = vmatprep.mubr.bf16.mxu1 %v1518_v16  ;;  %v1426_v17 = vld [vmem:[%s1684_s2 + $0x78] sm:$0xff]   ;;  %v1428_v19 = vld [vmem:[%s1684_s2 + $0x68] sm:$0xff]   ;;  %v1429_v20 = vld [vmem:[%s1684_s2 + $0x60] sm:$0xff]  }
   0x8   :  { %1214 = vmatprep.subr.bf16.mxu0 %v1404_v2  ;;  %v1430_v21 = vld [vmem:[%s1684_s2 + $0x58] sm:$0xff]   ;;  %v1539_v46 = vld [vmem:[%s1686_s0 + $0x8] sm:$0xff]   ;;  %v1544_v47 = vld [vmem:[%s1686_s0 + $0x10] sm:$0xff]  }
   0x9   :  { %v1551_v48 = vld [vmem:[%s1686_s0 + $0x18] sm:$0xff]   ;;  %v1556_v49 = vld [vmem:[%s1686_s0 + $0x20] sm:$0xff]   ;;  %v1563_v50 = vld [vmem:[%s1686_s0 + $0x28] sm:$0xff]  }
   0xa   :  { %v1568_v51 = vld [vmem:[%s1686_s0 + $0x30] sm:$0xff]   ;;  %v1575_v52 = vld [vmem:[%s1686_s0 + $0x38] sm:$0xff]   ;;  %v1432_v54 = vld [vmem:[%s1684_s2 + $0x48] sm:$0xff]  }
   0xb   :  { %1215 = vmatpush3.bf16.msra.mxu0 %v1404_v2  ;;  %v1431_v53 = vld [vmem:[%s1684_s2 + $0x50] sm:$0xff]   ;;  %v1433_v55 = vld [vmem:[%s1684_s2 + $0x40] sm:$0xff]  }
   0xc   :  { %1216 = vmatprep.subr.bf16.mxu0 %v1405_v3  ;;  %v1053_v58 = vld [vmem:[%s1687_s3] ss:$0 sm:$0xff] }
   0xf   :  { %1217 = vmatpush3.bf16.msra.mxu0 %v1405_v3 }
  0x10   :  { %1218 = vmatprep.subr.bf16.mxu0 %v1406_v5 }
  0x13   :  { %1219 = vmatpush3.bf16.msra.mxu0 %v1406_v5 }
  0x14   :  { %1220 = vmatprep.subr.bf16.mxu0 %v1407_v6 }
  0x17   :  { %1221 = vmatpush3.bf16.msra.mxu0 %v1407_v6 }
  0x18   :  { %1222 = vmatprep.subr.bf16.mxu0 %v1408_v7 }
  0x1b   :  { %1223 = vmatpush3.bf16.msra.mxu0 %v1408_v7 }
  0x1c   :  { %1224 = vmatprep.subr.bf16.mxu0 %v1409_v8 }
  0x1f   :  { %1225 = vmatpush3.bf16.msra.mxu0 %v1409_v8 }
  0x20   :  { %1274 = vmatprep.subr.bf16.mxu0 %v1426_v17 }
  0x22   :  { %1227 = vmatmul.mubr.bf16.vlgmr.msra.gmra.mxu0 %v1411_v9 }
  0x23   :  { %1230 = vmatprep.mubr.bf16.mxu0 %v1412_v10  ;;  %1275 = vmatpush3.bf16.msra.mxu0 %v1426_v17 }
  0x24   :  { %1276 = vmatprep.subr.bf16.mxu0 %v1427_v18 }
  0x27   :  { %1277 = vmatpush3.bf16.msra.mxu0 %v1427_v18 }
  0x28   :  { %1278 = vmatprep.subr.bf16.mxu0 %v1428_v19 }
  0x2a   :  { %1231 = vmatmul.mubr.bf16.gmra.mxu0 %v1413_v11 }
  0x2b   :  { %1234 = vmatprep.mubr.bf16.mxu0 %v1414_v12  ;;  %1279 = vmatpush3.bf16.msra.mxu0 %v1428_v19 }
  0x2c   :  { %1280 = vmatprep.subr.bf16.mxu0 %v1429_v20 }
  0x2f   :  { %1281 = vmatpush3.bf16.msra.mxu0 %v1429_v20 }
  0x30   :  { %1282 = vmatprep.subr.bf16.mxu0 %v1430_v21 }
  0x32   :  { %1235 = vmatmul.mubr.bf16.gmra.mxu0 %v1415_v13 }
  0x33   :  { %1238 = vmatprep.mubr.bf16.mxu0 %v1416_v14  ;;  %1283 = vmatpush3.bf16.msra.mxu0 %v1430_v21 }
  0x34   :  { %1284 = vmatprep.subr.bf16.mxu0 %v1431_v53 }
  0x37   :  { %1285 = vmatpush3.bf16.msra.mxu0 %v1431_v53 }
  0x38   :  { %1286 = vmatprep.subr.bf16.mxu0 %v1432_v54 }
  0x3a   :  { %1239 = vmatmul.mubr.bf16.gmra.mxu0 %v1417_v15 }
  0x3b   :  { %1287 = vmatpush3.bf16.msra.mxu0 %v1432_v54 }
  0x3c   :  { %1288 = vmatprep.subr.bf16.mxu0 %v1433_v55 }
  0x3f   :  { %1289 = vmatpush3.bf16.msra.mxu0 %v1433_v55 }
  0xe2   :  { %v1228_v22 = vpop.f32.mrf.mxu0 }
  0xe4   :  { %v196_v23 = vpop.f32.mrf.mxu0 }
  0xe6   :  { %v1229_v24 = vpop.f32.mrf.mxu0 }
  0xe7   :  { %v260_v44 = vpack.c.bf16 %v1229_v24, %v1228_v22 }
  0xe8   :  { %v199_v25 = vpop.f32.mrf.mxu0 }
  0xe9   :  { %v259_v45 = vpack.c.bf16 %v199_v25, %v196_v23 }
  0xea   :  { %v1232_v26 = vpop.f32.mrf.mxu0 }
  0xec   :  { %v212_v27 = vpop.f32.mrf.mxu0 }
  0xee   :  { %v1233_v28 = vpop.f32.mrf.mxu0 }
  0xef   :  { %v262_v42 = vpack.c.bf16 %v1233_v28, %v1232_v26 }
  0xf0   :  { %v215_v29 = vpop.f32.mrf.mxu0 }
  0xf1   :  { %v261_v43 = vpack.c.bf16 %v215_v29, %v212_v27 }
  0xf2   :  { %v1236_v30 = vpop.f32.mrf.mxu0 }
  0xf4   :  { %v228_v31 = vpop.f32.mrf.mxu0 }
  0xf6   :  { %v1237_v32 = vpop.f32.mrf.mxu0 }
  0xf7   :  { %v264_v40 = vpack.c.bf16 %v1237_v32, %v1236_v30 }
  0xf8   :  { %v231_v33 = vpop.f32.mrf.mxu0 }
  0xf9   :  { %v263_v41 = vpack.c.bf16 %v231_v33, %v228_v31 }
  0xfa   :  { %v1240_v34 = vpop.f32.mrf.mxu0 }
  0xfc   :  { %v244_v35 = vpop.f32.mrf.mxu0 }
  0xfe   :  { %v1241_v36 = vpop.f32.mrf.mxu0 }
  0xff   :  { %v266_v37 = vpack.c.bf16 %v1241_v36, %v1240_v34 }
 0x100   :  { %v247_v38 = vpop.f32.mrf.mxu0 }
 0x101   :  { %v265_v39 = vpack.c.bf16 %v247_v38, %v244_v35  ;;  %1242 = vmatprep.subr.bf16.mxu1 %v266_v37 }
 0x102   :  { %1243 = vmatpush3.bf16.msra.mxu1 %v266_v37 }
 0x103   :  { %1244 = vmatprep.subr.bf16.mxu1 %v265_v39 }
 0x106   :  { %1245 = vmatpush3.bf16.msra.mxu1 %v265_v39 }
 0x107   :  { %1246 = vmatprep.subr.bf16.mxu1 %v264_v40 }
 0x10a   :  { %1247 = vmatpush3.bf16.msra.mxu1 %v264_v40 }
 0x10b   :  { %1248 = vmatprep.subr.bf16.mxu1 %v263_v41 }
 0x10e   :  { %1249 = vmatpush3.bf16.msra.mxu1 %v263_v41 }
 0x10f   :  { %1250 = vmatprep.subr.bf16.mxu1 %v262_v42 }
 0x112   :  { %1251 = vmatpush3.bf16.msra.mxu1 %v262_v42 }
 0x113   :  { %1252 = vmatprep.subr.bf16.mxu1 %v261_v43 }
 0x116   :  { %1253 = vmatpush3.bf16.msra.mxu1 %v261_v43 }
 0x117   :  { %1254 = vmatprep.subr.bf16.mxu1 %v260_v44 }
 0x11a   :  { %1255 = vmatpush3.bf16.msra.mxu1 %v260_v44 }
 0x11b   :  { %1256 = vmatprep.subr.bf16.mxu1 %v259_v45 }
 0x11e   :  { %1257 = vmatpush3.bf16.msra.mxu1 %v259_v45 }
 0x121   :  { %1259 = vmatmul.mubr.bf16.vlgmr.msra.gmra.mxu1 %v1539_v46 }
 0x122   :  { %1262 = vmatprep.mubr.bf16.mxu1 %v1544_v47 }
 0x129   :  { %1263 = vmatmul.mubr.bf16.gmra.mxu1 %v1551_v48 }
 0x12a   :  { %1266 = vmatprep.mubr.bf16.mxu1 %v1556_v49 }
 0x131   :  { %1267 = vmatmul.mubr.bf16.gmra.mxu1 %v1563_v50 }
 0x132   :  { %1270 = vmatprep.mubr.bf16.mxu1 %v1568_v51 }
 0x139   :  { %1271 = vmatmul.mubr.bf16.gmra.mxu1 %v1575_v52 }
 0x13a   :  { %1322 = vmatprep.mubr.bf16.mxu1 %v1518_v16 }
 0x1e1   :  { %v1260_v56 = vpop.f32.mrf.mxu1 }
 0x1e2   :  { %v365_v62 = vadd.f32 %v1260_v56, %v1053_v58 }
 0x1e3   :  { %v356_v57 = vpop.f32.mrf.mxu1 }
 0x1e4   :  { %v357_v60 = vadd.f32 %v1053_v58, %v356_v57  ;;  %v421_v5 = vmax.f32 %v365_v62, 0.0  ;;  %v1434_v57 = vld [vmem:[%s1684_s2 + $0xb8] sm:$0xff]  }
 0x1e5   :  { %v1261_v59 = vpop.f32.mrf.mxu1  ;;  %1338 = vmatprep.subr.bf16.mxu0 %v1434_v57 }
 0x1e6   :  { %v368_v61 = vadd.f32 %v1261_v59, %v1053_v58  ;;  %v419_v3 = vmax.f32 %v357_v60, 0.0  ;;  %v1435_v59 = vld [vmem:[%s1684_s2 + $0xb0] sm:$0xff]   ;;  %v1437_v60 = vld [vmem:[%s1684_s2 + $0xa0] sm:$0xff]  }
 0x1e7   :  { %v359_v63 = vpop.f32.mrf.mxu1 }
 0x1e8   :  { %v360_v0 = vadd.f32 %v1053_v58, %v359_v63  ;;  %v422_v1 = vmax.f32 %v368_v61, 0.0  ;;  %v1438_v61 = vld [vmem:[%s1684_s2 + $0x98] sm:$0xff]  }
 0x1e9   :  { %v1264_v2 = vpop.f32.mrf.mxu1 }
 0x1ea   :  { %v420_v4 = vmax.f32 %v360_v0, 0.0  ;;  %v436_v8 = vpack.c.bf16 %v422_v1, %v421_v5  ;;  %v381_v12 = vadd.f32 %v1264_v2, %v1053_v58 }
 0x1eb   :  { %v372_v6 = vpop.f32.mrf.mxu1 }
 0x1ec   :  { %v435_v7 = vpack.c.bf16 %v420_v4, %v419_v3  ;;  %v373_v10 = vadd.f32 %v1053_v58, %v372_v6  ;;  %v425_v20 = vmax.f32 %v381_v12, 0.0 }
 0x1ed   :  { %v1265_v9 = vpop.f32.mrf.mxu1 }
 0x1ee   :  { %v384_v11 = vadd.f32 %v1265_v9, %v1053_v58  ;;  %1290 = vmatprep.mubr.bf16.mxu0 %v435_v7  ;;  %v423_v18 = vmax.f32 %v373_v10, 0.0 }
 0x1ef   :  { %v375_v13 = vpop.f32.mrf.mxu1  ;;  %1291 = vmatmul.mubr.bf16.vlgmr.msra.gmra.mxu0 %v436_v8 }
 0x1f0   :  { %v376_v14 = vadd.f32 %v1053_v58, %v375_v13  ;;  %v426_v15 = vmax.f32 %v384_v11, 0.0  ;;  %1339 = vmatpush3.bf16.msra.mxu0 %v1434_v57 }
 0x1f1   :  { %v1268_v17 = vpop.f32.mrf.mxu1  ;;  %1340 = vmatprep.subr.bf16.mxu0 %v1435_v59 }
 0x1f2   :  { %v424_v19 = vmax.f32 %v376_v14, 0.0  ;;  %v438_v23 = vpack.c.bf16 %v426_v15, %v425_v20  ;;  %v397_v27 = vadd.f32 %v1268_v17, %v1053_v58 }
 0x1f3   :  { %v388_v21 = vpop.f32.mrf.mxu1 }
 0x1f4   :  { %v437_v22 = vpack.c.bf16 %v424_v19, %v423_v18  ;;  %v389_v25 = vadd.f32 %v1053_v58, %v388_v21  ;;  %v429_v34 = vmax.f32 %v397_v27, 0.0  ;;  %1341 = vmatpush3.bf16.msra.mxu0 %v1435_v59  ;;  %v1087_v27 = vld [vmem:[%s1687_s3 + $0x1] ss:$0 sm:$0xff] }
 0x1f5   :  { %v1269_v24 = vpop.f32.mrf.mxu1 }
 0x1f6   :  { %v400_v26 = vadd.f32 %v1269_v24, %v1053_v58  ;;  %1294 = vmatprep.mubr.bf16.mxu0 %v437_v22  ;;  %v427_v32 = vmax.f32 %v389_v25, 0.0  ;;  %v1440_v24 = vld [vmem:[%s1684_s2 + $0x88] sm:$0xff]   ;;  %v1441_v25 = vld [vmem:[%s1684_s2 + $0x80] sm:$0xff]  }
 0x1f7   :  { %v391_v28 = vpop.f32.mrf.mxu1  ;;  %1295 = vmatmul.mubr.bf16.gmra.mxu0 %v438_v23  ;;  %v1439_v23 = vld [vmem:[%s1684_s2 + $0x90] sm:$0xff]  }
 0x1f8   :  { %v392_v29 = vadd.f32 %v1053_v58, %v391_v28  ;;  %v430_v30 = vmax.f32 %v400_v26, 0.0 }
 0x1f9   :  { %v1272_v31 = vpop.f32.mrf.mxu1 }
 0x1fa   :  { %v428_v33 = vmax.f32 %v392_v29, 0.0  ;;  %v440_v37 = vpack.c.bf16 %v430_v30, %v429_v34  ;;  %v413_v41 = vadd.f32 %v1272_v31, %v1053_v58 }
 0x1fb   :  { %v404_v35 = vpop.f32.mrf.mxu1 }
 0x1fc   :  { %v439_v36 = vpack.c.bf16 %v428_v33, %v427_v32  ;;  %v405_v39 = vadd.f32 %v1053_v58, %v404_v35  ;;  %v433_v54 = vmax.f32 %v413_v41, 0.0 }
 0x1fd   :  { %v1273_v38 = vpop.f32.mrf.mxu1 }
 0x1fe   :  { %v416_v40 = vadd.f32 %v1273_v38, %v1053_v58  ;;  %1298 = vmatprep.mubr.bf16.mxu0 %v439_v36  ;;  %v431_v45 = vmax.f32 %v405_v39, 0.0 }
 0x1ff   :  { %v407_v42 = vpop.f32.mrf.mxu1  ;;  %1299 = vmatmul.mubr.bf16.gmra.mxu0 %v440_v37 }
 0x200   :  { %v408_v43 = vadd.f32 %v1053_v58, %v407_v42  ;;  %v434_v44 = vmax.f32 %v416_v40, 0.0  ;;  %v1436_v58 = vld [vmem:[%s1684_s2 + $0xa8] sm:$0xff]  }
 0x201   :  { %1342 = vmatprep.subr.bf16.mxu0 %v1436_v58 }
 0x202   :  { %v432_v53 = vmax.f32 %v408_v43, 0.0  ;;  %v442_v56 = vpack.c.bf16 %v434_v44, %v433_v54  ;;  %1343 = vmatpush3.bf16.msra.mxu0 %v1436_v58 }
 0x203   :  { %1344 = vmatprep.subr.bf16.mxu0 %v1437_v60 }
 0x204   :  { %v441_v55 = vpack.c.bf16 %v432_v53, %v431_v45 }
 0x206   :  { %1302 = vmatprep.mubr.bf16.mxu0 %v441_v55  ;;  %1345 = vmatpush3.bf16.msra.mxu0 %v1437_v60 }
 0x207   :  { %1303 = vmatmul.mubr.bf16.gmra.mxu0 %v442_v56  ;;  %1346 = vmatprep.subr.bf16.mxu0 %v1438_v61 }
 0x20a   :  { %1347 = vmatpush3.bf16.msra.mxu0 %v1438_v61 }
 0x20b   :  { %1348 = vmatprep.subr.bf16.mxu0 %v1439_v23 }
 0x20e   :  { %1349 = vmatpush3.bf16.msra.mxu0 %v1439_v23 }
 0x20f   :  { %1350 = vmatprep.subr.bf16.mxu0 %v1440_v24 }
 0x212   :  { %1351 = vmatpush3.bf16.msra.mxu0 %v1440_v24 }
 0x213   :  { %1352 = vmatprep.subr.bf16.mxu0 %v1441_v25 }
 0x216   :  { %1353 = vmatpush3.bf16.msra.mxu0 %v1441_v25 }
 0x2af   :  { %v1292_v62 = vpop.f32.mrf.mxu0 }
 0x2b1   :  { %v542_v63 = vpop.f32.mrf.mxu0 }
 0x2b3   :  { %v1293_v0 = vpop.f32.mrf.mxu0 }
 0x2b4   :  { %v606_v21 = vpack.c.bf16 %v1293_v0, %v1292_v62 }
 0x2b5   :  { %v545_v1 = vpop.f32.mrf.mxu0 }
 0x2b6   :  { %v605_v22 = vpack.c.bf16 %v545_v1, %v542_v63 }
 0x2b7   :  { %v1296_v2 = vpop.f32.mrf.mxu0 }
 0x2b9   :  { %v558_v3 = vpop.f32.mrf.mxu0 }
 0x2bb   :  { %v1297_v4 = vpop.f32.mrf.mxu0 }
 0x2bc   :  { %v608_v19 = vpack.c.bf16 %v1297_v4, %v1296_v2 }
 0x2bd   :  { %v561_v5 = vpop.f32.mrf.mxu0 }
 0x2be   :  { %v607_v20 = vpack.c.bf16 %v561_v5, %v558_v3 }
 0x2bf   :  { %v1300_v6 = vpop.f32.mrf.mxu0 }
 0x2c1   :  { %v574_v7 = vpop.f32.mrf.mxu0 }
 0x2c3   :  { %v1301_v8 = vpop.f32.mrf.mxu0 }
 0x2c4   :  { %v610_v17 = vpack.c.bf16 %v1301_v8, %v1300_v6 }
 0x2c5   :  { %v577_v9 = vpop.f32.mrf.mxu0 }
 0x2c6   :  { %v609_v18 = vpack.c.bf16 %v577_v9, %v574_v7 }
 0x2c7   :  { %v1304_v10 = vpop.f32.mrf.mxu0 }
 0x2c9   :  { %v590_v11 = vpop.f32.mrf.mxu0 }
 0x2cb   :  { %v1305_v12 = vpop.f32.mrf.mxu0 }
 0x2cc   :  { %v612_v13 = vpack.c.bf16 %v1305_v12, %v1304_v10 }
 0x2cd   :  { %v593_v14 = vpop.f32.mrf.mxu0 }
 0x2ce   :  { %v611_v15 = vpack.c.bf16 %v593_v14, %v590_v11  ;;  %1306 = vmatprep.subr.bf16.mxu1 %v612_v13 }
 0x2cf   :  { %1307 = vmatpush3.bf16.msra.mxu1 %v612_v13 }
 0x2d0   :  { %1308 = vmatprep.subr.bf16.mxu1 %v611_v15 }
 0x2d3   :  { %1309 = vmatpush3.bf16.msra.mxu1 %v611_v15 }
 0x2d4   :  { %1310 = vmatprep.subr.bf16.mxu1 %v610_v17 }
 0x2d7   :  { %1311 = vmatpush3.bf16.msra.mxu1 %v610_v17 }
 0x2d8   :  { %1312 = vmatprep.subr.bf16.mxu1 %v609_v18 }
 0x2db   :  { %1313 = vmatpush3.bf16.msra.mxu1 %v609_v18 }
 0x2dc   :  { %1314 = vmatprep.subr.bf16.mxu1 %v608_v19 }
 0x2df   :  { %1315 = vmatpush3.bf16.msra.mxu1 %v608_v19 }
 0x2e0   :  { %1316 = vmatprep.subr.bf16.mxu1 %v607_v20 }
 0x2e3   :  { %1317 = vmatpush3.bf16.msra.mxu1 %v607_v20 }
 0x2e4   :  { %1318 = vmatprep.subr.bf16.mxu1 %v606_v21 }
 0x2e7   :  { %1319 = vmatpush3.bf16.msra.mxu1 %v606_v21 }
 0x2e8   :  { %1320 = vmatprep.subr.bf16.mxu1 %v605_v22 }
 0x2eb   :  { %1321 = vmatpush3.bf16.msra.mxu1 %v605_v22 }
 0x2ee   :  { %1323 = vmatmul.mubr.bf16.vlgmr.msra.gmra.mxu1 %v1539_v46 }
 0x2ef   :  { %1326 = vmatprep.mubr.bf16.mxu1 %v1544_v47 }
 0x2f6   :  { %1327 = vmatmul.mubr.bf16.gmra.mxu1 %v1551_v48 }
 0x2f7   :  { %1330 = vmatprep.mubr.bf16.mxu1 %v1556_v49 }
 0x2fe   :  { %1331 = vmatmul.mubr.bf16.gmra.mxu1 %v1563_v50 }
 0x2ff   :  { %1334 = vmatprep.mubr.bf16.mxu1 %v1568_v51 }
 0x306   :  { %1335 = vmatmul.mubr.bf16.gmra.mxu1 %v1575_v52 }
 0x307   :  { %1386 = vmatprep.mubr.bf16.mxu1 %v1518_v16 }
 0x3ae   :  { %v1324_v26 = vpop.f32.mrf.mxu1 }
 0x3af   :  { %v664_v31 = vadd.f32 %v1324_v26, %v1087_v27 }
 0x3b0   :  { %v655_v16 = vpop.f32.mrf.mxu1 }
 0x3b1   :  { %v656_v29 = vadd.f32 %v1087_v27, %v655_v16  ;;  %v720_v38 = vmax.f32 %v664_v31, 0.0 }
 0x3b2   :  { %v1325_v28 = vpop.f32.mrf.mxu1 }
 0x3b3   :  { %v667_v30 = vadd.f32 %v1325_v28, %v1087_v27  ;;  %v718_v36 = vmax.f32 %v656_v29, 0.0 }
 0x3b4   :  { %v658_v32 = vpop.f32.mrf.mxu1 }
 0x3b5   :  { %v659_v33 = vadd.f32 %v1087_v27, %v658_v32  ;;  %v721_v34 = vmax.f32 %v667_v30, 0.0 }
 0x3b6   :  { %v1328_v35 = vpop.f32.mrf.mxu1 }
 0x3b7   :  { %v719_v37 = vmax.f32 %v659_v33, 0.0  ;;  %v735_v41 = vpack.c.bf16 %v721_v34, %v720_v38  ;;  %v680_v45 = vadd.f32 %v1328_v35, %v1087_v27 }
 0x3b8   :  { %v671_v39 = vpop.f32.mrf.mxu1 }
 0x3b9   :  { %v734_v40 = vpack.c.bf16 %v719_v37, %v718_v36  ;;  %v672_v43 = vadd.f32 %v1087_v27, %v671_v39  ;;  %v724_v58 = vmax.f32 %v680_v45, 0.0 }
 0x3ba   :  { %v1329_v42 = vpop.f32.mrf.mxu1 }
 0x3bb   :  { %v683_v44 = vadd.f32 %v1329_v42, %v1087_v27  ;;  %1354 = vmatprep.mubr.bf16.mxu0 %v734_v40  ;;  %v722_v57 = vmax.f32 %v672_v43, 0.0 }
 0x3bc   :  { %v674_v53 = vpop.f32.mrf.mxu1  ;;  %1355 = vmatmul.mubr.bf16.vlgmr.msra.gmra.mxu0 %v735_v41 }
 0x3bd   :  { %v675_v54 = vadd.f32 %v1087_v27, %v674_v53  ;;  %v725_v55 = vmax.f32 %v683_v44, 0.0 }
 0x3be   :  { %v1332_v56 = vpop.f32.mrf.mxu1 }
 0x3bf   :  { %v723_v59 = vmax.f32 %v675_v54, 0.0  ;;  %v737_v62 = vpack.c.bf16 %v725_v55, %v724_v58  ;;  %v696_v2 = vadd.f32 %v1332_v56, %v1087_v27  ;;  %v1113_v56 = vld [vmem:[%s1687_s3 + $0x2] ss:$0 sm:$0xff] }
 0x3c0   :  { %v687_v60 = vpop.f32.mrf.mxu1 }
 0x3c1   :  { %v736_v61 = vpack.c.bf16 %v723_v59, %v722_v57  ;;  %v688_v0 = vadd.f32 %v1087_v27, %v687_v60  ;;  %v728_v9 = vmax.f32 %v696_v2, 0.0 }
 0x3c2   :  { %v1333_v63 = vpop.f32.mrf.mxu1 }
 0x3c3   :  { %v699_v1 = vadd.f32 %v1333_v63, %v1087_v27  ;;  %1358 = vmatprep.mubr.bf16.mxu0 %v736_v61  ;;  %v726_v7 = vmax.f32 %v688_v0, 0.0 }
 0x3c4   :  { %v690_v3 = vpop.f32.mrf.mxu1  ;;  %1359 = vmatmul.mubr.bf16.gmra.mxu0 %v737_v62 }
 0x3c5   :  { %v691_v4 = vadd.f32 %v1087_v27, %v690_v3  ;;  %v729_v5 = vmax.f32 %v699_v1, 0.0 }
 0x3c6   :  { %v1336_v6 = vpop.f32.mrf.mxu1 }
 0x3c7   :  { %v727_v8 = vmax.f32 %v691_v4, 0.0  ;;  %v739_v12 = vpack.c.bf16 %v729_v5, %v728_v9  ;;  %v712_v17 = vadd.f32 %v1336_v6, %v1087_v27 }
 0x3c8   :  { %v703_v10 = vpop.f32.mrf.mxu1 }
 0x3c9   :  { %v738_v11 = vpack.c.bf16 %v727_v8, %v726_v7  ;;  %v704_v14 = vadd.f32 %v1087_v27, %v703_v10  ;;  %v732_v23 = vmax.f32 %v712_v17, 0.0 }
 0x3ca   :  { %v1337_v13 = vpop.f32.mrf.mxu1 }
 0x3cb   :  { %v715_v15 = vadd.f32 %v1337_v13, %v1087_v27  ;;  %1362 = vmatprep.mubr.bf16.mxu0 %v738_v11  ;;  %v730_v21 = vmax.f32 %v704_v14, 0.0 }
 0x3cc   :  { %v706_v18 = vpop.f32.mrf.mxu1  ;;  %1363 = vmatmul.mubr.bf16.gmra.mxu0 %v739_v12 }
 0x3cd   :  { %v707_v19 = vadd.f32 %v1087_v27, %v706_v18  ;;  %v733_v20 = vmax.f32 %v715_v15, 0.0 }
 0x3cf   :  { %v731_v22 = vmax.f32 %v707_v19, 0.0  ;;  %v741_v25 = vpack.c.bf16 %v733_v20, %v732_v23 }
 0x3d1   :  { %v740_v24 = vpack.c.bf16 %v731_v22, %v730_v21 }
 0x3d3   :  { %1366 = vmatprep.mubr.bf16.mxu0 %v740_v24 }
 0x3d4   :  { %1367 = vmatmul.mubr.bf16.gmra.mxu0 %v741_v25 }
 0x47c   :  { %v1356_v26 = vpop.f32.mrf.mxu0 }
 0x47e   :  { %v841_v16 = vpop.f32.mrf.mxu0 }
 0x480   :  { %v1357_v28 = vpop.f32.mrf.mxu0 }
 0x481   :  { %v905_v54 = vpack.c.bf16 %v1357_v28, %v1356_v26 }
 0x482   :  { %v844_v29 = vpop.f32.mrf.mxu0 }
 0x483   :  { %v904_v55 = vpack.c.bf16 %v844_v29, %v841_v16 }
 0x484   :  { %v1360_v30 = vpop.f32.mrf.mxu0 }
 0x486   :  { %v857_v31 = vpop.f32.mrf.mxu0 }
 0x488   :  { %v1361_v32 = vpop.f32.mrf.mxu0 }
 0x489   :  { %v907_v45 = vpack.c.bf16 %v1361_v32, %v1360_v30 }
 0x48a   :  { %v860_v33 = vpop.f32.mrf.mxu0 }
 0x48b   :  { %v906_v53 = vpack.c.bf16 %v860_v33, %v857_v31 }
 0x48c   :  { %v1364_v34 = vpop.f32.mrf.mxu0 }
 0x48e   :  { %v873_v35 = vpop.f32.mrf.mxu0 }
 0x490   :  { %v1365_v36 = vpop.f32.mrf.mxu0 }
 0x491   :  { %v909_v43 = vpack.c.bf16 %v1365_v36, %v1364_v34 }
 0x492   :  { %v876_v27 = vpop.f32.mrf.mxu0 }
 0x493   :  { %v908_v44 = vpack.c.bf16 %v876_v27, %v873_v35 }
 0x494   :  { %v1368_v37 = vpop.f32.mrf.mxu0 }
 0x496   :  { %v889_v38 = vpop.f32.mrf.mxu0 }
 0x498   :  { %v1369_v39 = vpop.f32.mrf.mxu0 }
 0x499   :  { %v911_v40 = vpack.c.bf16 %v1369_v39, %v1368_v37 }
 0x49a   :  { %v892_v41 = vpop.f32.mrf.mxu0 }
 0x49b   :  { %v910_v42 = vpack.c.bf16 %v892_v41, %v889_v38  ;;  %1370 = vmatprep.subr.bf16.mxu1 %v911_v40 }
 0x49c   :  { %1371 = vmatpush3.bf16.msra.mxu1 %v911_v40 }
 0x49d   :  { %1372 = vmatprep.subr.bf16.mxu1 %v910_v42 }
 0x4a0   :  { %1373 = vmatpush3.bf16.msra.mxu1 %v910_v42 }
 0x4a1   :  { %1374 = vmatprep.subr.bf16.mxu1 %v909_v43 }
 0x4a4   :  { %1375 = vmatpush3.bf16.msra.mxu1 %v909_v43 }
 0x4a5   :  { %1376 = vmatprep.subr.bf16.mxu1 %v908_v44 }
 0x4a8   :  { %1377 = vmatpush3.bf16.msra.mxu1 %v908_v44 }
 0x4a9   :  { %1378 = vmatprep.subr.bf16.mxu1 %v907_v45 }
 0x4ac   :  { %1379 = vmatpush3.bf16.msra.mxu1 %v907_v45 }
 0x4ad   :  { %1380 = vmatprep.subr.bf16.mxu1 %v906_v53 }
 0x4b0   :  { %1381 = vmatpush3.bf16.msra.mxu1 %v906_v53 }
 0x4b1   :  { %1382 = vmatprep.subr.bf16.mxu1 %v905_v54 }
 0x4b4   :  { %1383 = vmatpush3.bf16.msra.mxu1 %v905_v54 }
 0x4b5   :  { %1384 = vmatprep.subr.bf16.mxu1 %v904_v55 }
 0x4b8   :  { %1385 = vmatpush3.bf16.msra.mxu1 %v904_v55 }
 0x4bb   :  { %1387 = vmatmul.mubr.bf16.vlgmr.msra.gmra.mxu1 %v1539_v46 }
 0x4bc   :  { %1390 = vmatprep.mubr.bf16.mxu1 %v1544_v47 }
 0x4c3   :  { %1391 = vmatmul.mubr.bf16.gmra.mxu1 %v1551_v48 }
 0x4c4   :  { %1394 = vmatprep.mubr.bf16.mxu1 %v1556_v49 }
 0x4cb   :  { %1395 = vmatmul.mubr.bf16.gmra.mxu1 %v1563_v50 }
 0x4cc   :  { %1398 = vmatprep.mubr.bf16.mxu1 %v1568_v51 }
 0x4d3   :  { %1399 = vmatmul.mubr.bf16.gmra.mxu1 %v1575_v52 }
 0x57b   :  { %v1388_v57 = vpop.f32.mrf.mxu1 }
 0x57c   :  { %v963_v59 = vadd.f32 %v1388_v57, %v1113_v56 }
 0x57d   :  { %v954_v58 = vpop.f32.mrf.mxu1 }
 0x57e   :  { %1019 = vst [vmem:[%s1688_s4 + $0x10] sm:$0xff] %v963_v59  ;;  %v955_v46 = vadd.f32 %v1113_v56, %v954_v58 }
 0x57f   :  { %v1389_v47 = vpop.f32.mrf.mxu1 }
 0x580   :  { %1017 = vst [vmem:[%s1688_s4] sm:$0xff] %v955_v46  ;;  %v966_v48 = vadd.f32 %v1389_v47, %v1113_v56 }
 0x581   :  { %v957_v49 = vpop.f32.mrf.mxu1 }
 0x582   :  { %1020 = vst [vmem:[%s1688_s4 + $0x18] sm:$0xff] %v966_v48  ;;  %v958_v50 = vadd.f32 %v1113_v56, %v957_v49 }
 0x583   :  { %v1392_v51 = vpop.f32.mrf.mxu1 }
 0x584   :  { %1018 = vst [vmem:[%s1688_s4 + $0x8] sm:$0xff] %v958_v50  ;;  %v979_v52 = vadd.f32 %v1392_v51, %v1113_v56 }
 0x585   :  { %v970_v60 = vpop.f32.mrf.mxu1 }
 0x586   :  { %1023 = vst [vmem:[%s1688_s4 + $0x30] sm:$0xff] %v979_v52  ;;  %v971_v61 = vadd.f32 %v1113_v56, %v970_v60 }
 0x587   :  { %v1393_v62 = vpop.f32.mrf.mxu1 }
 0x588   :  { %1021 = vst [vmem:[%s1688_s4 + $0x20] sm:$0xff] %v971_v61  ;;  %v982_v63 = vadd.f32 %v1393_v62, %v1113_v56 }
 0x589   :  { %v973_v0 = vpop.f32.mrf.mxu1 }
 0x58a   :  { %1024 = vst [vmem:[%s1688_s4 + $0x38] sm:$0xff] %v982_v63  ;;  %v974_v1 = vadd.f32 %v1113_v56, %v973_v0 }
 0x58b   :  { %v1396_v2 = vpop.f32.mrf.mxu1 }
 0x58c   :  { %1022 = vst [vmem:[%s1688_s4 + $0x28] sm:$0xff] %v974_v1  ;;  %v995_v3 = vadd.f32 %v1396_v2, %v1113_v56 }
 0x58d   :  { %v986_v4 = vpop.f32.mrf.mxu1 }
 0x58e   :  { %1027 = vst [vmem:[%s1688_s4 + $0x50] sm:$0xff] %v995_v3  ;;  %v987_v5 = vadd.f32 %v1113_v56, %v986_v4 }
 0x58f   :  { %v1397_v6 = vpop.f32.mrf.mxu1 }
 0x590   :  { %1025 = vst [vmem:[%s1688_s4 + $0x40] sm:$0xff] %v987_v5  ;;  %v998_v7 = vadd.f32 %v1397_v6, %v1113_v56 }
 0x591   :  { %v989_v8 = vpop.f32.mrf.mxu1 }
 0x592   :  { %1028 = vst [vmem:[%s1688_s4 + $0x58] sm:$0xff] %v998_v7  ;;  %v990_v9 = vadd.f32 %v1113_v56, %v989_v8 }
 0x593   :  { %v1400_v10 = vpop.f32.mrf.mxu1 }
 0x594   :  { %1026 = vst [vmem:[%s1688_s4 + $0x48] sm:$0xff] %v990_v9  ;;  %v1011_v11 = vadd.f32 %v1400_v10, %v1113_v56 }
 0x595   :  { %v1002_v12 = vpop.f32.mrf.mxu1 }
 0x596   :  { %1031 = vst [vmem:[%s1688_s4 + $0x70] sm:$0xff] %v1011_v11  ;;  %v1003_v13 = vadd.f32 %v1113_v56, %v1002_v12 }
 0x597   :  { %v1401_v14 = vpop.f32.mrf.mxu1 }
 0x598   :  { %1029 = vst [vmem:[%s1688_s4 + $0x60] sm:$0xff] %v1003_v13  ;;  %v1014_v15 = vadd.f32 %v1401_v14, %v1113_v56 }
 0x599   :  { %v1005_v17 = vpop.f32.mrf.mxu1 }
 0x59a   :  { %1032 = vst [vmem:[%s1688_s4 + $0x78] sm:$0xff] %v1014_v15  ;;  %v1006_v18 = vadd.f32 %v1113_v56, %v1005_v17 }
 0x59c   :  { %1030 = vst [vmem:[%s1688_s4 + $0x68] sm:$0xff] %v1006_v18 }

</bundles_post_ra>
